<compile_context>
chip_gen: v5e
topology: v5e:2x2
jax: 0.10.0
libtpu: 0.0.40
codegen_flags: <defaults>
</compile_context>

<pallas_src>
import math

import jax
import jax.numpy as jnp
from jax import lax
from jax.experimental import pallas as pl
from jax.experimental.pallas import tpu as pltpu


_SQRT_HALF = 0.7071067811865476
_VMEM_LIMIT_BYTES = 48 * 1024 * 1024   # > v5e/v6e scoped defaults, < v7x 64 MiB physical


def _gelu_exact(x):
    # PyTorch nn.GELU default (approximate='none'): 0.5*x*(1+erf(x/sqrt(2)))
    return 0.5 * x * (1.0 + lax.erf(x * jnp.float32(_SQRT_HALF)))


def _mlp_layers_kernel(x_ref, w1_ref, b_ref, w2_ref, o_ref):
    """One grid step = one group of G latents applied to the whole batch."""
    _, G, L, _ = w2_ref.shape
    B = x_ref.shape[0]

    x = x_ref[...]                    # (B, Z)      resident across grid steps
    w1 = w1_ref[0]                    # (Z, G*L)    fused first-layer weights
    bias = b_ref[0]                   # (2, G*L)    [b1 ; b2] merged -> one DMA
    b1 = bias[0:1, :]
    b2 = bias[1:2, :]

    h = jnp.dot(x, w1, preferred_element_type=jnp.float32,
                precision=lax.Precision.HIGHEST) + b1
    h = _gelu_exact(h)                # (B, G*L)

    if L % 128 == 0:
        # Lane-aligned per-latent blocks: small unrolled loop of G matmuls, each
        # writing an unmasked, lane-dense (B, L) column slice of the output slab.
        for g in range(G):
            og = jnp.dot(h[:, g * L:(g + 1) * L], w2_ref[0, g],
                         preferred_element_type=jnp.float32,
                         precision=lax.Precision.HIGHEST)
            og = og + b2[:, g * L:(g + 1) * L]
            o_ref[:, g * L:(g + 1) * L] = og.astype(o_ref.dtype)
    else:
        # General path: one batched matmul over the G latents on the compact
        # (G, L, L) second-layer weights (no block-diagonal materialization).
        w2 = w2_ref[0]                                            # (G, L, L)
        h3 = jnp.transpose(h.reshape(B, G, L), (1, 0, 2))         # (G, B, L)
        o3 = jnp.einsum('gbl,glm->gbm', h3, w2,
                        preferred_element_type=jnp.float32,
                        precision=lax.Precision.HIGHEST)          # (G, B, L)
        o = jnp.transpose(o3, (1, 0, 2)).reshape(B, G * L) + b2
        o_ref[...] = o.astype(o_ref.dtype)


def _choose_group(num_latents, latent_dim, z_dim, *, itemsize=4, batch_hint=8,
                  vmem_budget=36 * 1024 * 1024, max_fused_width=2048,
                  hbm_bw=1.2e12, step_overhead=0.35e-6):
    """Largest lane-aligned group G (GL % 128 == 0) minimizing a simple
    DMA-bytes + per-step-overhead cost, under a double-buffered VMEM budget
    (sized to be safe on v7x's 64 MiB/TC), preferring >=2 grid steps."""
    NL, L, Z = num_latents, latent_dim, z_dim
    B = max(batch_hint, 8)
    g_unit = 128 // math.gcd(L, 128)          # smallest G making G*L lane-aligned

    def padded(G):
        return -(-NL // G) * G

    def fits(G):
        GL = G * L
        w_bytes = (Z * GL + G * L * L + 2 * GL) * itemsize     # W1 + W2 + biases tile
        tot = 2 * w_bytes + 2 * B * GL * itemsize + 2 * B * Z * itemsize
        return tot <= vmem_budget

    def cost(G):
        per_latent = (Z * L + L * L + 2 * L) * itemsize
        return padded(G) * per_latent / hbm_bw + (padded(G) // G) * step_overhead

    g_hi = max(g_unit, (max(1, max_fused_width // L) // g_unit) * g_unit)
    g_hi = max(g_unit, min(g_hi, -(-NL // g_unit) * g_unit))
    cands = [g for g in range(g_unit, g_hi + 1, g_unit) if fits(g)]
    if not cands:
        cands = [g_unit]                       # minimal lane-aligned fallback
    best = min(cost(g) for g in cands)
    near = [g for g in cands if cost(g) <= 1.15 * best]
    multi = [g for g in near if padded(g) // g >= 2]   # keep >=2 steps for v7x megacore
    pool = multi if multi else near
    return min(pool, key=lambda g: (cost(g), -g))


def pack_mlp_layers_params(w1, b1, w2, b2, *, batch_hint=8,
                           vmem_budget=36 * 1024 * 1024, max_fused_width=2048):
    """One-time weight packing (call at init/load time, NOT per forward).

    w1: (NL, Z, L); b1: (NL, L); w2: (NL, L, L); b2: (NL, L)."""
    NL, Z, L = w1.shape
    G = _choose_group(NL, L, Z, batch_hint=batch_hint,
                      vmem_budget=vmem_budget, max_fused_width=max_fused_width)
    NL_pad = -(-NL // G) * G
    pad = NL_pad - NL
    if pad:
        # Zero-pad latents so the fused width stays a multiple of 128 lanes
        # (lane-dense output slab instead of masked partial stores).
        w1 = jnp.concatenate([w1, jnp.zeros((pad, Z, L), w1.dtype)], axis=0)
        b1 = jnp.concatenate([b1, jnp.zeros((pad, L), b1.dtype)], axis=0)
        w2 = jnp.concatenate([w2, jnp.zeros((pad, L, L), w2.dtype)], axis=0)
        b2 = jnp.concatenate([b2, jnp.zeros((pad, L), b2.dtype)], axis=0)
    NG = NL_pad // G
    GL = G * L
    # Fused first-layer weights: column block g of group n is W1[n*G + g].
    w1g = jnp.reshape(jnp.transpose(jnp.reshape(w1, (NG, G, Z, L)), (0, 2, 1, 3)),
                      (NG, Z, GL))
    # Merged biases: one (2, GL) tile per group -> single DMA per step.
    bg = jnp.stack([jnp.reshape(b1, (NG, GL)), jnp.reshape(b2, (NG, GL))], axis=1)
    # Compact per-latent second-layer weights (pure reshape, no duplication).
    w2g = jnp.reshape(w2, (NG, G, L, L))
    return {
        "w1": w1g, "bias": bg, "w2": w2g,
        "num_latents": NL, "latent_dim": L, "z_dim": Z,
        "group": G, "num_groups": NG,
    }


def mlp_layers_forward(x, params):
    """x: (B, Z); params from pack_mlp_layers_params. Returns (B, NL, L)."""
    B, Z = x.shape
    assert Z == params["z_dim"], (Z, params["z_dim"])
    w1g, bg, w2g = params["w1"], params["bias"], params["w2"]
    NG, G = params["num_groups"], params["group"]
    L, NL = params["latent_dim"], params["num_latents"]
    GL = G * L

    # TODO(synk): for large B, add an outer 'parallel' batch grid axis with
    # >=128-row tiles; here B is small so the whole batch stays resident in VMEM.
    out_flat = pl.pallas_call(
        _mlp_layers_kernel,
        out_shape=jax.ShapeDtypeStruct((B, NG * GL), x.dtype),
        grid_spec=pltpu.PrefetchScalarGridSpec(
            num_scalar_prefetch=0,
            grid=(NG,),
            in_specs=[
                pl.BlockSpec((B, Z), lambda i: (0, 0)),              # x (shared, resident)
                pl.BlockSpec((1, Z, GL), lambda i: (i, 0, 0)),       # fused W1 group
                pl.BlockSpec((1, 2, GL), lambda i: (i, 0, 0)),       # merged b1/b2
                pl.BlockSpec((1, G, L, L), lambda i: (i, 0, 0, 0)),  # compact W2 group
            ],
            # Lane-dense output slab: (B, G*L) block of the flat (B, NL_pad*L) output.
            out_specs=pl.BlockSpec((B, GL), lambda i: (0, i)),
        ),
        compiler_params=pltpu.CompilerParams(
            dimension_semantics=("parallel",),
            vmem_limit_bytes=_VMEM_LIMIT_BYTES),
    )(x, w1g, bg, w2g)

    # Drop padded latents (no-op when unpadded); (B, NL*L) -> (B, NL, L) is a
    # pure reshape whose column ordering matches torch.cat([... [:, None, :]], dim=1).
    return out_flat[:, :NL * L].reshape(B, NL, L)


def init_params(key, z_dim, latent_dim, num_latents, dtype=jnp.float32):
    """Deterministic synthetic init mimicking nn.Linear's uniform(-1/sqrt(fan_in), +)."""
    k1, k2, k3, k4 = jax.random.split(key, 4)
    lim1 = 1.0 / jnp.sqrt(jnp.float32(z_dim))
    lim2 = 1.0 / jnp.sqrt(jnp.float32(latent_dim))
    w1 = jax.random.uniform(k1, (num_latents, z_dim, latent_dim), dtype, -lim1, lim1)
    b1 = jax.random.uniform(k2, (num_latents, latent_dim), dtype, -lim1, lim1)
    w2 = jax.random.uniform(k3, (num_latents, latent_dim, latent_dim), dtype, -lim2, lim2)
    b2 = jax.random.uniform(k4, (num_latents, latent_dim), dtype, -lim2, lim2)
    return w1, b1, w2, b2


def reference_forward(x, w1, b1, w2, b2):
    """Pure-JAX reference of MLP_layers.forward."""
    h = jnp.einsum('bz,nzl->nbl', x, w1,
                   precision=lax.Precision.HIGHEST) + b1[:, None, :]
    h = 0.5 * h * (1.0 + lax.erf(h / jnp.sqrt(jnp.float32(2.0))))
    o = jnp.einsum('nbl,nlm->nbm', h, w2,
                   precision=lax.Precision.HIGHEST) + b2[:, None, :]
    return jnp.transpose(o, (1, 0, 2))


if __name__ == "__main__":
    key = jax.random.PRNGKey(0)
    cases = [
        # (B,  Z,   L,  NL)
        (2, 32, 32, 4),    # tiny L -> grouped (G=4, GL=128), batched-matmul path
        (4, 64, 128, 3),   # lane-aligned L -> unrolled column-slice path (G=3)
        (2, 48, 32, 5),    # NL not a multiple of the lane-aligned G -> padded latents
    ]
    for idx, (B, Z, L, NL) in enumerate(cases):
        key, kx, kp = jax.random.split(key, 3)
        x = jax.random.normal(kx, (B, Z), jnp.float32)
        w1, b1, w2, b2 = init_params(kp, Z, L, NL)
        packed = pack_mlp_layers_params(w1, b1, w2, b2, batch_hint=B)   # once, at load time
        out = jax.block_until_ready(mlp_layers_forward(x, packed))
        ref = jax.block_until_ready(reference_forward(x, w1, b1, w2, b2))
        assert out.shape == (B, NL, L), (idx, out.shape)
        assert bool(jnp.allclose(out, ref, atol=1e-5, rtol=1e-5)), f"mismatch vs reference (case {idx})"
    print("KERNEL_OK")
</pallas_src>

<mosaic_0001>
module attributes {stable_mosaic.version = 11 : i64} {
  func.func @_mlp_layers_kernel(%arg0: i32, %arg1: memref<2x32xf32, #tpu.memory_space<vmem>>, %arg2: memref<1x32x128xf32, #tpu.memory_space<vmem>>, %arg3: memref<1x2x128xf32, #tpu.memory_space<vmem>>, %arg4: memref<1x4x32x32xf32, #tpu.memory_space<vmem>>, %arg5: memref<2x128xf32, #tpu.memory_space<vmem>>) attributes {dimension_semantics = [#tpu.dimension_semantics<parallel>], iteration_bounds = array<i64: 1>, scalar_prefetch = 0 : i64, scratch_operands = 0 : i64, tpu.core_type = #tpu.core_type<tc>, window_params = [{pipeline_mode = #tpu.pipeline_mode<synchronous>, transform_indices = @transform_0, window_bounds = array<i64: 2, 32>}, {transform_indices = @transform_1, window_bounds = array<i64: 1, 32, 128>}, {transform_indices = @transform_2, window_bounds = array<i64: 1, 2, 128>}, {transform_indices = @transform_3, window_bounds = array<i64: 1, 4, 32, 32>}, {transform_indices = @transform_4, window_bounds = array<i64: 2, 128>}]} {
    %c0 = arith.constant 0 : index
    %c0_0 = arith.constant 0 : index
    %0 = vector.load %arg1[%c0, %c0_0] : memref<2x32xf32, #tpu.memory_space<vmem>>, vector<2x32xf32>
    %c0_1 = arith.constant 0 : index
    %c0_2 = arith.constant 0 : index
    %c0_3 = arith.constant 0 : index
    %1 = vector.load %arg2[%c0_1, %c0_2, %c0_3] : memref<1x32x128xf32, #tpu.memory_space<vmem>>, vector<1x32x128xf32>
    %2 = vector.shape_cast %1 : vector<1x32x128xf32> to vector<32x128xf32>
    %c0_4 = arith.constant 0 : index
    %c0_5 = arith.constant 0 : index
    %c0_6 = arith.constant 0 : index
    %3 = vector.load %arg3[%c0_4, %c0_5, %c0_6] : memref<1x2x128xf32, #tpu.memory_space<vmem>>, vector<1x2x128xf32>
    %4 = vector.shape_cast %3 : vector<1x2x128xf32> to vector<2x128xf32>
    %5 = vector.extract_strided_slice %4 {offsets = [0, 0], sizes = [1, 128], strides = [1, 1]} : vector<2x128xf32> to vector<1x128xf32>
    %6 = vector.extract_strided_slice %4 {offsets = [1, 0], sizes = [1, 128], strides = [1, 1]} : vector<2x128xf32> to vector<1x128xf32>
    %cst = arith.constant dense<0.000000e+00> : vector<2x128xf32>
    %7 = tpu.matmul %0, %2, %cst {dimension_numbers = #tpu.dot_dimension_numbers<[1], [0], [0], [1], [0, 0, 1, 1], [], []>, precision = #tpu.contract_precision<fp32>} : vector<2x32xf32>, vector<32x128xf32>, vector<2x128xf32> -> vector<2x128xf32>
    %8 = vector.broadcast %5 : vector<1x128xf32> to vector<2x128xf32>
    %9 = arith.addf %7, %8 : vector<2x128xf32>
    %cst_7 = arith.constant 5.000000e-01 : f32
    %10 = vector.broadcast %cst_7 : f32 to vector<2x128xf32>
    %11 = arith.mulf %10, %9 : vector<2x128xf32>
    %cst_8 = arith.constant 0.707106769 : f32
    %12 = vector.broadcast %cst_8 : f32 to vector<2x128xf32>
    %13 = arith.mulf %9, %12 : vector<2x128xf32>
    %14 = math.erf %13 : vector<2x128xf32>
    %cst_9 = arith.constant 1.000000e+00 : f32
    %15 = vector.broadcast %cst_9 : f32 to vector<2x128xf32>
    %16 = arith.addf %15, %14 : vector<2x128xf32>
    %17 = arith.mulf %11, %16 : vector<2x128xf32>
    %c0_10 = arith.constant 0 : index
    %c0_11 = arith.constant 0 : index
    %c0_12 = arith.constant 0 : index
    %c0_13 = arith.constant 0 : index
    %18 = vector.load %arg4[%c0_10, %c0_11, %c0_12, %c0_13] : memref<1x4x32x32xf32, #tpu.memory_space<vmem>>, vector<1x4x32x32xf32>
    %19 = vector.shape_cast %18 : vector<1x4x32x32xf32> to vector<4x32x32xf32>
    %20 = vector.shape_cast %17 : vector<2x128xf32> to vector<2x4x32xf32>
    %21 = tpu.transpose %20, [1, 0, 2] : vector<2x4x32xf32> -> vector<4x2x32xf32>
    "tpu.trace_start"() <{level = 10 : i32, message = "gbl,glm->gbm"}> : () -> ()
    %cst_14 = arith.constant dense<0.000000e+00> : vector<4x2x32xf32>
    %22 = tpu.matmul %21, %19, %cst_14 {dimension_numbers = #tpu.dot_dimension_numbers<[2], [1], [1], [2], [0, 0, 0, 1, 1, 2], [0], [0]>, precision = #tpu.contract_precision<fp32>} : vector<4x2x32xf32>, vector<4x32x32xf32>, vector<4x2x32xf32> -> vector<4x2x32xf32>
    "tpu.trace_stop"() : () -> ()
    %23 = tpu.transpose %22, [1, 0, 2] : vector<4x2x32xf32> -> vector<2x4x32xf32>
    %24 = vector.shape_cast %23 : vector<2x4x32xf32> to vector<2x128xf32>
    %25 = vector.broadcast %6 : vector<1x128xf32> to vector<2x128xf32>
    %26 = arith.addf %24, %25 : vector<2x128xf32>
    %c0_15 = arith.constant 0 : index
    %c0_16 = arith.constant 0 : index
    %27 = vector.load %arg5[%c0_15, %c0_16] : memref<2x128xf32, #tpu.memory_space<vmem>>, vector<2x128xf32>
    tpu.vector_store %arg5[%c0_15, %c0_16], %26 {strides = array<i32>} : memref<2x128xf32, #tpu.memory_space<vmem>>, vector<2x128xf32>,
    return
  }
  func.func @transform_0(%arg0: i32) -> (i32, i32) {
    %c0_i32 = arith.constant 0 : i32
    %c0_i32_0 = arith.constant 0 : i32
    %c0_i32_1 = arith.constant 0 : i32
    return %c0_i32, %c0_i32_0 : i32, i32
  }
  func.func @transform_1(%arg0: i32) -> (i32, i32, i32) {
    %c0_i32 = arith.constant 0 : i32
    %c0_i32_0 = arith.constant 0 : i32
    %c0_i32_1 = arith.constant 0 : i32
    return %arg0, %c0_i32, %c0_i32_0 : i32, i32, i32
  }
  func.func @transform_2(%arg0: i32) -> (i32, i32, i32) {
    %c0_i32 = arith.constant 0 : i32
    %c0_i32_0 = arith.constant 0 : i32
    %c0_i32_1 = arith.constant 0 : i32
    return %arg0, %c0_i32, %c0_i32_0 : i32, i32, i32
  }
  func.func @transform_3(%arg0: i32) -> (i32, i32, i32, i32) {
    %c0_i32 = arith.constant 0 : i32
    %c0_i32_0 = arith.constant 0 : i32
    %c0_i32_1 = arith.constant 0 : i32
    %c0_i32_2 = arith.constant 0 : i32
    return %arg0, %c0_i32, %c0_i32_0, %c0_i32_1 : i32, i32, i32, i32
  }
  func.func @transform_4(%arg0: i32) -> (i32, i32) {
    %c0_i32 = arith.constant 0 : i32
    %c0_i32_0 = arith.constant 0 : i32
    return %c0_i32, %arg0 : i32, i32
  }
}

</mosaic_0001>

<bundles_post_ra>
// kernel: tpu_custom_call.1
= control target key start
LH: loop header
LB: loop body
LE: loop exit
PB: predicated region body
PF: predicated region fallthrough
CT: control target
= control target key end

     0   :  { %9 = vsyncpa [#allocation3], 0  ;;  %s1671_s0 = inlined_call_operand.hbm [shape: f32[2,32], index: 0, kind: input, shape index: {}]   ;;  %s1672_s1 = inlined_call_operand.hbm [shape: f32[1,32,128], index: 1, kind: input, shape index: {}]   ;;  %s1673_s2 = inlined_call_operand.hbm [shape: f32[1,2,128], index: 2, kind: input, shape index: {}]   ;;  %s1674_s3 = inlined_call_operand.hbm [shape: f32[1,4,32,32], index: 3, kind: input, shape index: {}]   ;;  %s1675_s4 = inlined_call_operand.hbm [shape: f32[2,128], index: 4, kind: output, shape index: {}]  }
   0x1   :  { %10 = vsyncpa [#allocation6], 0 }
   0x2   :  { %11 = vsyncpa [#allocation9], 0  ;;  %s28_s17 = sshll.u32 %s1672_s1, 4  ;;  %s29_s17 = int_to_ptr.hbm [resolvable:$true] %s28_s17 }
   0x3   :  { %12 = vsyncpa [#allocation4], 0  ;;  %s1366_s18 = smov [#allocation5]   ;;  %s18_s22 = sshll.u32 %s1671_s0, 4  ;;  %s19_s22 = int_to_ptr.hbm [resolvable:$true] %s18_s22 }
   0x4   :  { %s30_s19 = sshll.u32 %s1366_s18, 4  ;;  %s1367_s23 = smov 128   ;;  %s31_s19 = int_to_ptr.vmem [resolvable:$true] %s30_s19 }
   0x5   :  { %s1368_s24 = smov 8   ;;  %s1369_s25 = smov [#allocation2]  }
   0x6   :  { %36 = dma.hbm_to_vmem [thread:$0]  %s29_s17, 512, %s31_s19, [#allocation6], %s1367_s23, %s1367_s23, %s1368_s24  }
   0x7   :  { %s20_s26 = sshll.u32 %s1369_s25, 4  ;;  %s42_s29 = sshll.u32 %s1673_s2, 4  ;;  %s21_s26 = int_to_ptr.vmem [resolvable:$true] %s20_s26  ;;  %s43_s29 = int_to_ptr.hbm [resolvable:$true] %s42_s29 }
   0x8   :  { %23 = dma.hbm_to_vmem [thread:$0]  %s19_s22, 32, %s21_s26, [#allocation3]  }
   0x9   :  { %s52_s5 = sshll.u32 %s1674_s3, 4  ;;  %s1370_s6 = smov [#allocation7]   ;;  %s53_s5 = int_to_ptr.hbm [resolvable:$true] %s52_s5 }
   0xa   :  { %s44_s7 = sshll.u32 %s1370_s6, 4  ;;  %s1371_s0 = smov [#allocation8]   ;;  %s45_s7 = int_to_ptr.vmem [resolvable:$true] %s44_s7 }
   0xb   :  { %47 = dma.hbm_to_vmem [thread:$0]  %s43_s29, 32, %s45_s7, [#allocation6]  }
   0xc   :  { %s54_s8 = sshll.u32 %s1371_s0, 4  ;;  %s55_s8 = int_to_ptr.vmem [resolvable:$true] %s54_s8 }
   0xd   :  { %60 = dma.hbm_to_vmem [thread:$0]  %s53_s5, 2048, %s55_s8, [#allocation9], %s1367_s23, %s1367_s23, %s1368_s24  }
   0xe   :  { %1358 = dma.done.wait [#allocation3], 32  }
   0xf   :  { %1359 = vsyncadd [#allocation3], 4294967264 }
  0x10   :  { %1360 = dma.done.wait [#allocation6], 544  }
  0x11   :  { %1361 = vsyncadd [#allocation6], 4294966752 }
  0x12   :  { %1362 = dma.done.wait [#allocation9], 2048  }
  0x13   :  { %1363 = vsyncadd [#allocation9], 4294965248  ;;  %vm84_vm0 = vcmask 261120   ;;  %v81_v0 = vld [vmem:[#allocation5 + $0x18] sm:$0xff]  ;;  %v80_v1 = vld [vmem:[#allocation5 + $0x10] sm:$0xff]  ;;  %s1372_s2 = smov 64  }
  0x14   :  { %v79_v2 = vld [vmem:[#allocation5 + $0x8] sm:$0xff]  ;;  %v100_v3 = vand.u32 4294901760, %v81_v0  ;;  %v102_v4 = vand.u32 4294901760, %v80_v1  ;;  %v78_v6 = vld [vmem:[#allocation5] sm:$0xff]  ;;  %v77_v7 = vld [vmem:[#allocation2] sm:$0x3] }
  0x15   :  { %v104_v5 = vand.u32 4294901760, %v79_v2  ;;  %v106_v8 = vand.u32 4294901760, %v78_v6  ;;  %v86_v9 = vsel %vm84_vm0, %v77_v7, 0  ;;  %v1416_v31 = vld [vmem:[#allocation7] sm:$0x3]  ;;  %s1373_s3 = smov 32  }
  0x16   :  { %v130_v10 = vsub.f32 %v81_v0, %v100_v3  ;;  %101 = vmatpush.msra.mxu0 %v100_v3  ;;  %v136_v11 = vsub.f32 %v80_v1, %v102_v4  ;;  %201 = vmatpush.msra.mxu3 %v100_v3  ;;  %v108_v13 = vand.u32 4294901760, %v86_v9  ;;  %v83_v32 = vperm.slane %v1416_v31, 0  ;;  %s1374_s9 = smov 96   ;;  %s1377_s10 = smov [#allocation10]  }
  0x17   :  { %v142_v12 = vsub.f32 %v79_v2, %v104_v5  ;;  %v148_v14 = vsub.f32 %v78_v6, %v106_v8  ;;  %vm344_vm5 = vcmask 1047556   ;;  %vm1197_vm6 = vcmask 523264   ;;  %s1209_s11 = sshll.u32 %s1377_s10, 4  ;;  %s1211_s14 = sshll.u32 %s1675_s4, 4  ;;  %s1210_s11 = int_to_ptr.vmem [resolvable:$true] %s1209_s11  ;;  %s1212_s14 = int_to_ptr.hbm [resolvable:$true] %s1211_s14 }
  0x18   :  { %172 = vmatpush.msra.mxu2 %v130_v10  ;;  %103 = vmatpush.msra.mxu0 %v102_v4  ;;  %v131_v15 = vand.u32 4294901760, %v130_v10  ;;  %v137_v16 = vand.u32 4294901760, %v136_v11  ;;  %v109_v17 = vsub.f32 %v86_v9, %v108_v13  ;;  %vm1199_vm7 = vcmask 785408  }
  0x19   :  { %v143_v18 = vand.u32 4294901760, %v142_v12  ;;  %203 = vmatpush.msra.mxu3 %v102_v4  ;;  %v149_v19 = vand.u32 4294901760, %v148_v14 }
  0x1a   :  { %175 = vmatpush.msra.mxu2 %v136_v11  ;;  %v132_v20 = vsub.f32 %v130_v10, %v131_v15  ;;  %105 = vmatpush.msra.mxu0 %v104_v5  ;;  %v138_v21 = vsub.f32 %v136_v11, %v137_v16  ;;  %v110_v23 = vand.u32 4294901760, %v109_v17 }
  0x1b   :  { %v144_v22 = vsub.f32 %v142_v12, %v143_v18  ;;  %205 = vmatpush.msra.mxu3 %v104_v5  ;;  %v150_v27 = vsub.f32 %v148_v14, %v149_v19 }
  0x1c   :  { %v133_v24 = vand.u32 4294901760, %v132_v20  ;;  %178 = vmatpush.msra.mxu2 %v142_v12  ;;  %v139_v25 = vand.u32 4294901760, %v138_v21  ;;  %107 = vmatpush.msra.mxu0 %v106_v8  ;;  %v111_v26 = vsub.f32 %v109_v17, %v110_v23  ;;  %v320_v20 = vld [vmem:[#allocation8 + $0x18] sm:$0xff] }
  0x1d   :  { %207 = vmatpush.msra.mxu3 %v106_v8  ;;  %v145_v28 = vand.u32 4294901760, %v144_v22  ;;  %v151_v30 = vand.u32 4294901760, %v150_v27  ;;  %v403_v21 = vand.u32 4294901760, %v320_v20  ;;  %v319_v22 = vld [vmem:[#allocation8 + $0x10] sm:$0xff] }
  0x1e   :  { %230 = vmatpush.msrb.mxu0 %v131_v15  ;;  %134 = vmatpush.msra.mxu1 %v133_v24  ;;  %v112_v29 = vand.u32 4294901760, %v111_v26  ;;  %v405_v24 = vand.u32 4294901760, %v319_v22 }
  0x1f   :  { %181 = vmatpush.msra.mxu2 %v148_v14  ;;  %211 = vmatmul.f32.vlgmr.msra.gmra.mxu3 %v110_v23  ;;  %v433_v23 = vsub.f32 %v320_v20, %v403_v21 }
  0x20   :  { %184 = vmatmul.f32.vlgmr.msra.gmra.mxu2 %v109_v17  ;;  %140 = vmatpush.msra.mxu1 %v139_v25  ;;  %v318_v25 = vld [vmem:[#allocation8 + $0x8] sm:$0xff]  ;;  %v439_v27 = vsub.f32 %v319_v22, %v405_v24 }
  0x21   :  { %113 = vmatmul.f32.vlgmr.msra.gmra.mxu0 %v112_v29  ;;  %404 = vmatpush.msrb.mxu2 %v403_v21  ;;  %v434_v26 = vand.u32 4294901760, %v433_v23  ;;  %v317_v29 = vld [vmem:[#allocation8] sm:$0xff] }
  0x22   :  { %234 = vmatpush.msrb.mxu0 %v137_v16  ;;  %146 = vmatpush.msra.mxu1 %v145_v28  ;;  %v407_v28 = vand.u32 4294901760, %v318_v25 }
  0x23   :  { %406 = vmatpush.msrb.mxu2 %v405_v24 }
  0x24   :  { %238 = vmatpush.msrb.mxu0 %v143_v18  ;;  %152 = vmatpush.msra.mxu1 %v151_v30  ;;  %v435_v30 = vsub.f32 %v433_v23, %v434_v26 }
  0x25   :  { %154 = vmatmul.f32.vlgmr.msra.gmra.mxu1 %v108_v13  ;;  %408 = vmatpush.msrb.mxu2 %v407_v28 }
  0x26   :  { %242 = vmatpush.msrb.mxu0 %v149_v19  ;;  %261 = vmatpush.msrb.mxu1 %v100_v3 }
  0x28   :  { %263 = vmatpush.msrb.mxu1 %v102_v4  ;;  %475 = vmatpush.msra.mxu0 %v433_v23 }
  0x29   :  { %244 = vmatmul.f32.vlgmr.msrb.gmra.mxu0 %v108_v13 }
  0x2a   :  { %265 = vmatpush.msrb.mxu1 %v104_v5  ;;  %478 = vmatpush.msra.mxu0 %v439_v27 }
  0x2c   :  { %267 = vmatpush.msrb.mxu1 %v106_v8 }
  0x2d   :  { %269 = vmatmul.f32.vlgmr.msrb.gmra.mxu1 %v108_v13 }
  0x2e   :  { %504 = vmatpush.msra.mxu1 %v403_v21 }
  0x30   :  { %506 = vmatpush.msra.mxu1 %v405_v24 }
  0x32   :  { %508 = vmatpush.msra.mxu1 %v407_v28 }
  0x9e   :  { %v114_v33 = vpop.f32.mrf.mxu0 }
  0x9f   :  { %v115_v34 = vadd.f32 %v114_v33, %v83_v32  ;;  %v440_v32 = vand.u32 4294901760, %v439_v27  ;;  %v445_v33 = vsub.f32 %v318_v25, %v407_v28  ;;  %v328_v25 = vld [vmem:[#allocation8 + $0x58] sm:$0xff] }
  0xa1   :  { %481 = vmatpush.msra.mxu0 %v445_v33 }
  0xa2   :  { %v155_v35 = vpop.f32.mrf.mxu1  ;;  %v212_v38 = vpop.f32.mrf.mxu3 }
  0xa3   :  { %v185_v36 = vpop.f32.mrf.mxu2  ;;  %v156_v37 = vadd.f32 %v155_v35, %v115_v34  ;;  %v409_v34 = vand.u32 4294901760, %v317_v29  ;;  %v436_v35 = vand.u32 4294901760, %v435_v30 }
  0xa5   :  { %v186_v39 = vadd.f32 %v185_v36, %v156_v37  ;;  %v441_v36 = vsub.f32 %v439_v27, %v440_v32  ;;  %v446_v37 = vand.u32 4294901760, %v445_v33  ;;  %510 = vmatpush.msra.mxu1 %v409_v34  ;;  %410 = vmatpush.msrb.mxu2 %v409_v34  ;;  %v1480_v27 = vand.u32 4294901760, %v328_v25 }
  0xa6   :  { %v245_v40 = vpop.f32.mrf.mxu0  ;;  %437 = vmatpush.msrb.mxu3 %v436_v35 }
  0xa7   :  { %v213_v41 = vadd.f32 %v212_v38, %v186_v39  ;;  %v451_v38 = vsub.f32 %v317_v29, %v409_v34  ;;  %v442_v39 = vand.u32 4294901760, %v441_v36  ;;  %533 = vmatpush.msra.mxu2 %v434_v26  ;;  %v1487_v35 = vsub.f32 %v328_v25, %v1480_v27  ;;  %v325_v36 = vld [vmem:[#allocation8 + $0x40] sm:$0xff] }
  0xa8   :  { %v329_v25 = vld [vmem:[#allocation8 + $0x60] sm:$0xff] }
  0xa9   :  { %v246_v42 = vadd.f32 %v245_v40, %v213_v41  ;;  %v447_v40 = vsub.f32 %v445_v33, %v446_v37  ;;  %v452_v41 = vand.u32 4294901760, %v451_v38  ;;  %484 = vmatpush.msra.mxu0 %v451_v38  ;;  %443 = vmatpush.msrb.mxu3 %v442_v39 }
  0xaa   :  { %v270_v43 = vpop.f32.mrf.mxu1  ;;  %537 = vmatpush.msra.mxu2 %v440_v32  ;;  %v326_v32 = vld [vmem:[#allocation8 + $0x48] sm:$0xff] }
  0xab   :  { %v271_v44 = vadd.f32 %v270_v43, %v246_v42  ;;  %v324_v42 = vld [vmem:[#allocation8 + $0x38] sm:$0xff]  ;;  %v448_v43 = vand.u32 4294901760, %v447_v40 }
  0xac   :  { %541 = vmatpush.msra.mxu2 %v446_v37 }
  0xad   :  { %v274_v45 = vmul.f32 0.70710677, %v271_v44  ;;  %v273_v17 = vmul.f32 0.5, %v271_v44  ;;  %v453_v44 = vsub.f32 %v451_v38, %v452_v41  ;;  %449 = vmatpush.msrb.mxu3 %v448_v43  ;;  %v1490_v38 = vand.u32 4294901760, %v326_v32 }
  0xae   :  { %545 = vmatpush.msra.mxu2 %v452_v41  ;;  %v1496_v43 = vand.u32 4294901760, %v325_v36 }
  0xaf   :  { %v275_v46 = vmul.f32 %v274_v45, %v274_v45 }
  0xb1   :  { %v276_v47 = vmin.f32 %v275_v46, 16.0  ;;  %v323_v46 = vld [vmem:[#allocation8 + $0x30] sm:$0xff] }
  0xb3   :  { %v277_v48 = vmul.f32 2.1237322e-06, %v276_v47  ;;  %v288_v49 = vmul.f32 3.8918573e-05, %v276_v47 }
  0xb5   :  { %v278_v50 = vadd.f32 0.00028619796, %v277_v48  ;;  %v289_v51 = vadd.f32 0.001143296, %v288_v49  ;;  %v1433_v49 = vand.u32 4294901760, %v323_v46 }
  0xb7   :  { %v279_v52 = vmul.f32 %v278_v50, %v276_v47  ;;  %v290_v53 = vmul.f32 %v289_v51, %v276_v47  ;;  %v322_v50 = vld [vmem:[#allocation8 + $0x28] sm:$0xff] }
  0xb9   :  { %v291_v54 = vadd.f32 0.014752088, %v290_v53  ;;  %v280_v55 = vadd.f32 0.0036580483, %v279_v52  ;;  %v1438_v52 = vsub.f32 %v323_v46, %v1433_v49  ;;  %v1440_v53 = vand.u32 4294901760, %v322_v50 }
  0xba   :  { %v810_v46 = vand.u32 4294901760, %v1487_v35 }
  0xbb   :  { %v292_v56 = vmul.f32 %v291_v54, %v276_v47  ;;  %v281_v58 = vmul.f32 %v280_v55, %v276_v47  ;;  %v321_v54 = vld [vmem:[#allocation8 + $0x20] sm:$0xff] }
  0xbd   :  { %v293_v57 = vadd.f32 0.112945676, %v292_v56  ;;  %v282_v61 = vadd.f32 0.05243302, %v281_v58  ;;  %v1448_v58 = vsub.f32 %v322_v50, %v1440_v53  ;;  %v1503_v50 = vsub.f32 %v326_v32, %v1490_v38 }
  0xbf   :  { %v294_v59 = vmul.f32 %v293_v57, %v276_v47  ;;  %v283_v0 = vmul.f32 %v282_v61, %v276_v47  ;;  %v628_v57 = vand.u32 4294901760, %v1438_v52 }
  0xc1   :  { %v295_v60 = vadd.f32 0.4994258, %v294_v59  ;;  %v284_v1 = vadd.f32 0.18741608, %v283_v0  ;;  %v1450_v59 = vand.u32 4294901760, %v321_v54 }
  0xc3   :  { %v296_v62 = vmul.f32 %v295_v60, %v276_v47  ;;  %v285_v3 = vmul.f32 %v284_v1, %v276_v47  ;;  %v454_v47 = vand.u32 4294901760, %v453_v44  ;;  %v1458_v0 = vsub.f32 %v321_v54, %v1450_v59 }
  0xc4   :  { %v1375_v1 = vmov 1983009808  }
  0xc5   :  { %v297_v63 = vadd.f32 1.0, %v296_v62  ;;  %v286_v7 = vadd.f32 1.1283791, %v285_v3  ;;  %455 = vmatpush.msrb.mxu3 %v454_v47  ;;  %v629_v62 = vsub.f32 %v1438_v52, %v628_v57 }
  0xc7   :  { %1236 = vrcp.f32 %v297_v63  ;;  %v309_v6 = vand.u32 2147483648, %v297_v63  ;;  %v307_v9 = vand.u32 2147483647, %v297_v63  ;;  %vm303_vm2 = vweird.f32 %v297_v63  ;;  %564 = vmatpush.msra.mxu3 %v403_v21 }
  0xc8   :  { %v287_v12 = vmul.f32 %v286_v7, %v274_v45  ;;  %v1427_v45 = vand.u32 4294901760, %v324_v42  ;;  %v630_v3 = vand.u32 4294901760, %v629_v62  ;;  %v1514_v62 = vsub.f32 %v325_v36, %v1496_v43 }
  0xc9   :  { %v310_v11 = vor.u32 1.1754944e-38, %v309_v6  ;;  %vm308_vm4 = vcmp.eq.f32.partialorder %v307_v9, 8.507059e+37  ;;  %566 = vmatpush.msra.mxu3 %v405_v24 }
  0xca   :  { %592 = vmatpush.msrb.mxu0 %v1427_v45  ;;  %v1431_v48 = vsub.f32 %v324_v42, %v1427_v45 }
  0xcb   :  { %568 = vmatpush.msra.mxu3 %v407_v28  ;;  %v327_v28 = vld [vmem:[#allocation8 + $0x50] sm:$0xff] }
  0xcc   :  { %v622_v51 = vand.u32 4294901760, %v1431_v48  ;;  %594 = vmatpush.msrb.mxu0 %v1433_v49  ;;  %v1483_v33 = vand.u32 4294901760, %v327_v28 }
  0xcd   :  { %v1237_v2 = vpop.eup %1236  ;;  %570 = vmatpush.msra.mxu3 %v409_v34 }
  0xce   :  { %v299_v4 = vmul.f32 %v1237_v2, %v297_v63  ;;  %vm304_vm1 = vweird.f32 %v1237_v2  ;;  %v623_v56 = vsub.f32 %v1431_v48, %v622_v51  ;;  %596 = vmatpush.msrb.mxu0 %v1440_v53  ;;  %v634_v63 = vand.u32 4294901760, %v1448_v58 }
  0xcf   :  { %vm305_vm3 = vmor %vm303_vm2, %vm304_vm1  ;;  %v1494_v42 = vsub.f32 %v327_v28, %v1483_v33 }
  0xd0   :  { %v300_v5 = vsub.f32 1.0, %v299_v4  ;;  %v624_v61 = vand.u32 4294901760, %v623_v56  ;;  %598 = vmatpush.msrb.mxu0 %v1450_v59  ;;  %v635_v4 = vsub.f32 %v1448_v58, %v634_v63 }
  0xd2   :  { %v301_v8 = vmul.f32 %v1237_v2, %v300_v5  ;;  %625 = vmatpush.msrb.mxu1 %v624_v61  ;;  %v640_v5 = vand.u32 4294901760, %v1458_v0  ;;  %v636_v7 = vand.u32 4294901760, %v635_v4  ;;  %v816_v61 = vand.u32 4294901760, %v1494_v42 }
  0xd3   :  { %v822_v4 = vand.u32 4294901760, %v1503_v50 }
  0xd4   :  { %v302_v10 = vadd.f32 %v1237_v2, %v301_v8  ;;  %631 = vmatpush.msrb.mxu1 %v630_v3  ;;  %v641_v8 = vsub.f32 %v1458_v0, %v640_v5 }
  0xd6   :  { %v306_v13 = vsel %vm305_vm3, %v1237_v2, %v302_v10  ;;  %v347_v2 = vunpack.c.l.s4 %v1375_v1  ;;  %v1376_v10 = vmov 1934713408   ;;  %637 = vmatpush.msrb.mxu1 %v636_v7  ;;  %v332_v7 = vld [vmem:[#allocation8 + $0x78] sm:$0xff] }
  0xd7   :  { %v311_v14 = vsel %vm308_vm4, %v310_v11, %v306_v13  ;;  %v359_v11 = vunpack.c.l.s4 %v1376_v10  ;;  %v817_v10 = vsub.f32 %v1494_v42, %v816_v61 }
  0xd8   :  { %v312_v15 = vmul.f32 %v311_v14, %v287_v12  ;;  %v1467_v12 = vunpack.c.0.s8 %v347_v2  ;;  %v642_v14 = vand.u32 4294901760, %v641_v8  ;;  %v811_v2 = vsub.f32 %v1487_v35, %v810_v46 }
  0xda   :  { %v1223_v16 = vclamps-f32 %v312_v15, 1.0  ;;  %643 = vmatpush.msrb.mxu1 %v642_v14  ;;  %v1536_v14 = vand.u32 4294901760, %v332_v7 }
  0xdc   :  { %v315_v18 = vadd.f32 1.0, %v1223_v16 }
  0xde   :  { %v1419_v19 = vmul.f32 %v315_v18, %v273_v17  ;;  %v1473_v18 = vunpack.c.0.s8 %v359_v11  ;;  %v828_v11 = vand.u32 4294901760, %v1514_v62 }
  0xe0   :  { %337 = vrot.lane.b32.xlu1 %v1419_v19, %s1372_s2  ;;  %340 = vrot.lane.b32.xlu0 %v1419_v19, %s1373_s3 }
  0xe8   :  { %334 = vrot.lane.b32.xlu0 %v1419_v19, %s1374_s9 }
 0x152   :  { %v341_v55 = vpop.permute.xlu0 %340  ;;  %v338_v60 = vpop.permute.xlu1 %337 }
 0x153   :  { %v343_v6 = vrot.slane %v338_v60, 4  ;;  %v350_v9 = vrot.slane %v341_v55, 4 }
 0x155   :  { %v345_v15 = vsel %vm344_vm5, %v343_v6, %v1419_v19 }
 0x156   :  { %v349_v20 = vperm.slane %v345_v15, %v1467_v12  ;;  %v331_v15 = vld [vmem:[#allocation8 + $0x70] sm:$0xff] }
 0x15a   :  { %v335_v13 = vpop.permute.xlu0 %334 }
 0x15b   :  { %v351_v16 = vsel %vm344_vm5, %v350_v9, %v335_v13  ;;  %v812_v13 = vand.u32 4294901760, %v811_v2 }
 0x15c   :  { %v355_v17 = vperm.slane %v351_v16, %v1467_v12 }
 0x15e   :  { %v356_v21 = vrot.slane %v355_v17, 4 }
 0x160   :  { %v357_v22 = vsel %vm344_vm5, %v356_v21, %v349_v20  ;;  %v330_v20 = vld [vmem:[#allocation8 + $0x68] sm:$0xff]  ;;  %v818_v21 = vand.u32 4294901760, %v817_v10 }
 0x161   :  { %v361_v23 = vperm.slane %v357_v22, %v1473_v18  ;;  %v1551_v22 = vand.u32 4294901760, %v331_v15 }
 0x163   :  { %v366_v24 = vrot.slane %v361_v23, 4  ;;  %v365_v29 = vperm.slane %v361_v23, %v1467_v12  ;;  %v1555_v23 = vsub.f32 %v332_v7, %v1536_v14 }
 0x165   :  { %v367_v26 = vsel %vm344_vm5, 0.0, %v366_v24  ;;  %v374_v39 = vrot.slane %v365_v29, 4  ;;  %v998_v28 = vand.u32 4294901760, %v1555_v23 }
 0x166   :  { %v371_v19 = vperm.slane %v367_v26, %v1467_v12 }
 0x168   :  { %v372_v30 = vrot.slane %v371_v19, 4  ;;  %v375_v56 = vsel %vm344_vm5, %v371_v19, %v374_v39  ;;  %v1567_v19 = vsub.f32 %v331_v15, %v1551_v22 }
 0x169   :  { %v383_v6 = vperm.slane %v375_v56, %v1473_v18 }
 0x16a   :  { %v373_v34 = vsel %vm344_vm5, %v372_v30, %v365_v29  ;;  %v1574_v29 = vand.u32 4294901760, %v329_v25 }
 0x16b   :  { %v379_v37 = vperm.slane %v373_v34, %v1473_v18  ;;  %v386_v17 = vrot.slane %v383_v6, 4  ;;  %v765_v24 = vsel %vm84_vm0, %v383_v6, 0  ;;  %v999_v34 = vsub.f32 %v1555_v23, %v998_v28 }
 0x16c   :  { %v1593_v36 = vsub.f32 %v329_v25, %v1574_v29 }
 0x16d   :  { %v384_v40 = vrot.slane %v379_v37, 4  ;;  %v389_v41 = vsel %vm84_vm0, %v379_v37, 0  ;;  %v387_v26 = vsel %vm344_vm5, 0.0, %v386_v17 }
 0x16e   :  { %v1498_v44 = vand.u32 4294901760, %v389_v41  ;;  %v953_v30 = vsel %vm84_vm0, %v387_v26, 0 }
 0x16f   :  { %v385_v47 = vsel %vm344_vm5, 0.0, %v384_v40 }
 0x170   :  { %457 = vmatmul.f32.vlgmr.msrb.gmra.mxu3 %v1498_v44  ;;  %v412_v54 = vsub.f32 %v389_v41, %v1498_v44  ;;  %v577_v55 = vsel %vm84_vm0, %v385_v47, 0  ;;  %v1000_v41 = vand.u32 4294901760, %v999_v34 }
 0x171   :  { %692 = vmatpush.msrb.mxu3 %v1427_v45  ;;  %v1510_v60 = vand.u32 4294901760, %v577_v55 }
 0x172   :  { %487 = vmatmul.f32.vlgmr.msra.gmra.mxu0 %v412_v54  ;;  %v413_v1 = vand.u32 4294901760, %v412_v54 }
 0x173   :  { %v1520_v3 = vsub.f32 %v577_v55, %v1510_v60  ;;  %694 = vmatpush.msrb.mxu3 %v1433_v49  ;;  %721 = vmatpush.msra.mxu0 %v622_v51 }
 0x174   :  { %514 = vmatmul.f32.vlgmr.msra.gmra.mxu1 %v413_v1  ;;  %v414_v8 = vsub.f32 %v412_v54, %v413_v1 }
 0x175   :  { %v601_v9 = vand.u32 4294901760, %v1520_v3  ;;  %696 = vmatpush.msrb.mxu3 %v1440_v53  ;;  %752 = vmatpush.msra.mxu1 %v1427_v45  ;;  %v823_v45 = vsub.f32 %v1503_v50, %v822_v4 }
 0x176   :  { %v415_v51 = vand.u32 4294901760, %v414_v8  ;;  %725 = vmatpush.msra.mxu0 %v628_v57 }
 0x177   :  { %v602_v16 = vsub.f32 %v1520_v3, %v601_v9  ;;  %698 = vmatpush.msrb.mxu3 %v1450_v59  ;;  %754 = vmatpush.msra.mxu1 %v1433_v49  ;;  %v829_v49 = vsub.f32 %v1514_v62, %v828_v11 }
 0x178   :  { %416 = vmatmul.f32.vlgmr.msrb.gmra.mxu2 %v415_v51  ;;  %572 = vmatmul.f32.vlgmr.msra.gmra.mxu3 %v1498_v44 }
 0x179   :  { %v603_v57 = vand.u32 4294901760, %v602_v16  ;;  %663 = vmatpush.msrb.mxu2 %v1431_v48  ;;  %729 = vmatpush.msra.mxu0 %v634_v63  ;;  %v824_v48 = vand.u32 4294901760, %v823_v45  ;;  %v1559_v63 = vand.u32 4294901760, %v330_v20 }
 0x17a   :  { %756 = vmatpush.msra.mxu1 %v1440_v53  ;;  %813 = vmatpush.msra.mxu3 %v812_v13  ;;  %v830_v53 = vand.u32 4294901760, %v829_v49 }
 0x17b   :  { %604 = vmatmul.f32.vlgmr.msrb.gmra.mxu0 %v603_v57  ;;  %666 = vmatpush.msrb.mxu2 %v1438_v52  ;;  %v1571_v52 = vand.u32 4294901760, %v765_v24 }
 0x17c   :  { %645 = vmatmul.f32.vlgmr.msrb.gmra.mxu1 %v1510_v60  ;;  %733 = vmatpush.msra.mxu0 %v640_v5  ;;  %v1585_v5 = vand.u32 4294901760, %v953_v30 }
 0x17d   :  { %758 = vmatpush.msra.mxu1 %v1450_v59  ;;  %819 = vmatpush.msra.mxu3 %v818_v21  ;;  %v1579_v59 = vsub.f32 %v330_v20, %v1559_v63  ;;  %v788_v32 = vsub.f32 %v765_v24, %v1571_v52 }
 0x17e   :  { %669 = vmatpush.msrb.mxu2 %v1448_v58  ;;  %851 = vmatpush.msrb.mxu0 %v1487_v35  ;;  %v1004_v58 = vand.u32 4294901760, %v1567_v19  ;;  %v976_v39 = vsub.f32 %v953_v30, %v1585_v5 }
 0x17f   :  { %825 = vmatpush.msra.mxu3 %v824_v48  ;;  %880 = vmatpush.msrb.mxu1 %v1480_v27  ;;  %v789_v40 = vand.u32 4294901760, %v788_v32 }
 0x180   :  { %547 = vmatmul.f32.vlgmr.msra.gmra.mxu2 %v1498_v44  ;;  %702 = vmatmul.f32.vlgmr.msrb.gmra.mxu3 %v601_v9  ;;  %v1005_v37 = vsub.f32 %v1567_v19, %v1004_v58  ;;  %v1016_v44 = vand.u32 4294901760, %v1593_v36  ;;  %v977_v54 = vand.u32 4294901760, %v976_v39 }
 0x181   :  { %672 = vmatpush.msrb.mxu2 %v1458_v0  ;;  %854 = vmatpush.msrb.mxu0 %v1494_v42  ;;  %v1010_v0 = vand.u32 4294901760, %v1579_v59  ;;  %v790_v55 = vsub.f32 %v788_v32, %v789_v40 }
 0x182   :  { %831 = vmatpush.msra.mxu3 %v830_v53  ;;  %882 = vmatpush.msrb.mxu1 %v1483_v33  ;;  %v1017_v56 = vsub.f32 %v1593_v36, %v1016_v44 }
 0x183   :  { %735 = vmatmul.f32.vlgmr.msra.gmra.mxu0 %v1510_v60  ;;  %780 = vmatpush.msra.mxu2 %v1480_v27  ;;  %v1011_v47 = vsub.f32 %v1579_v59, %v1010_v0  ;;  %v791_v1 = vand.u32 4294901760, %v790_v55 }
 0x184   :  { %760 = vmatmul.f32.vlgmr.msra.gmra.mxu1 %v1510_v60  ;;  %857 = vmatpush.msrb.mxu0 %v1503_v50  ;;  %v978_v60 = vsub.f32 %v976_v39, %v977_v54 }
 0x185   :  { %884 = vmatpush.msrb.mxu1 %v1490_v38  ;;  %940 = vmatpush.msrb.mxu3 %v1480_v27  ;;  %v1006_v27 = vand.u32 4294901760, %v1005_v37 }
 0x186   :  { %782 = vmatpush.msra.mxu2 %v1483_v33  ;;  %860 = vmatpush.msrb.mxu0 %v1514_v62 }
 0x187   :  { %886 = vmatpush.msrb.mxu1 %v1496_v43  ;;  %942 = vmatpush.msrb.mxu3 %v1483_v33  ;;  %v1012_v33 = vand.u32 4294901760, %v1011_v47 }
 0x188   :  { %675 = vmatmul.f32.vlgmr.msrb.gmra.mxu2 %v1520_v3  ;;  %833 = vmatmul.f32.vlgmr.msra.gmra.mxu3 %v1571_v52 }
 0x189   :  { %784 = vmatpush.msra.mxu2 %v1490_v38  ;;  %968 = vmatpush.msra.mxu0 %v1536_v14 }
 0x18a   :  { %944 = vmatpush.msrb.mxu3 %v1490_v38  ;;  %1001 = vmatpush.msra.mxu1 %v1000_v41  ;;  %v1018_v38 = vand.u32 4294901760, %v1017_v56 }
 0x18b   :  { %863 = vmatmul.f32.vlgmr.msrb.gmra.mxu0 %v788_v32  ;;  %786 = vmatpush.msra.mxu2 %v1496_v43 }
 0x18c   :  { %890 = vmatmul.f32.vlgmr.msrb.gmra.mxu1 %v789_v40  ;;  %970 = vmatpush.msra.mxu0 %v1551_v22 }
 0x18d   :  { %946 = vmatpush.msrb.mxu3 %v1496_v43  ;;  %1007 = vmatpush.msra.mxu1 %v1006_v27  ;;  %v979_v43 = vand.u32 4294901760, %v978_v60 }
 0x18e   :  { %909 = vmatpush.msrb.mxu2 %v810_v46  ;;  %972 = vmatpush.msra.mxu0 %v1559_v63 }
 0x18f   :  { %1013 = vmatpush.msra.mxu1 %v1012_v33  ;;  %1068 = vmatpush.msra.mxu3 %v1536_v14 }
 0x190   :  { %792 = vmatmul.f32.vlgmr.msra.gmra.mxu2 %v791_v1  ;;  %948 = vmatmul.f32.vlgmr.msrb.gmra.mxu3 %v1571_v52 }
 0x191   :  { %913 = vmatpush.msrb.mxu2 %v816_v61  ;;  %974 = vmatpush.msra.mxu0 %v1574_v29 }
 0x192   :  { %1019 = vmatpush.msra.mxu1 %v1018_v38  ;;  %1070 = vmatpush.msra.mxu3 %v1551_v22 }
 0x193   :  { %980 = vmatmul.f32.vlgmr.msra.gmra.mxu0 %v979_v43  ;;  %917 = vmatpush.msrb.mxu2 %v822_v4 }
 0x194   :  { %1021 = vmatmul.f32.vlgmr.msra.gmra.mxu1 %v1585_v5  ;;  %1097 = vmatpush.msrb.mxu0 %v998_v28 }
 0x195   :  { %1072 = vmatpush.msra.mxu3 %v1559_v63  ;;  %1128 = vmatpush.msrb.mxu1 %v1536_v14 }
 0x196   :  { %921 = vmatpush.msrb.mxu2 %v828_v11  ;;  %1101 = vmatpush.msrb.mxu0 %v1004_v58 }
 0x197   :  { %1074 = vmatpush.msra.mxu3 %v1574_v29  ;;  %1130 = vmatpush.msrb.mxu1 %v1551_v22 }
 0x198   :  { %923 = vmatmul.f32.vlgmr.msrb.gmra.mxu2 %v1571_v52  ;;  %1078 = vmatmul.f32.vlgmr.msra.gmra.mxu3 %v977_v54 }
 0x199   :  { %1039 = vmatpush.msra.mxu2 %v1555_v23  ;;  %1105 = vmatpush.msrb.mxu0 %v1010_v0 }
 0x19a   :  { %1132 = vmatpush.msrb.mxu1 %v1559_v63 }
 0x19b   :  { %1042 = vmatpush.msra.mxu2 %v1567_v19  ;;  %1109 = vmatpush.msrb.mxu0 %v1016_v44 }
 0x19c   :  { %1111 = vmatmul.f32.vlgmr.msrb.gmra.mxu0 %v1585_v5  ;;  %1134 = vmatpush.msrb.mxu1 %v1574_v29 }
 0x19d   :  { %1045 = vmatpush.msra.mxu2 %v1579_v59  ;;  %1136 = vmatmul.f32.vlgmr.msrb.gmra.mxu1 %v1585_v5 }
 0x19f   :  { %1048 = vmatpush.msra.mxu2 %v1593_v36 }
 0x1a0   :  { %1051 = vmatmul.f32.vlgmr.msra.gmra.mxu2 %v976_v39 }
 0x1ef   :  { %v488_v42 = vpop.f32.mrf.mxu0 }
 0x1f1   :  { %v515_v46 = vpop.f32.mrf.mxu1 }
 0x1f3   :  { %v458_v35 = vpop.f32.mrf.mxu3 }
 0x1f8   :  { %v605_v62 = vpop.f32.mrf.mxu0 }
 0x1f9   :  { %v646_v2 = vpop.f32.mrf.mxu1 }
 0x1fa   :  { %v647_v17 = vadd.f32 %v646_v2, %v605_v62  ;;  %v1201_v2 = vperm.slane %v1416_v31, 1 }
 0x1fb   :  { %v417_v50 = vpop.f32.mrf.mxu2  ;;  %v573_v61 = vpop.f32.mrf.mxu3 }
 0x1fc   :  { %v459_v20 = vadd.f32 %v458_v35, %v417_v50 }
 0x1fe   :  { %v489_v22 = vadd.f32 %v488_v42, %v459_v20 }
 0x200   :  { %v736_v6 = vpop.f32.mrf.mxu0  ;;  %v516_v53 = vadd.f32 %v515_v46, %v489_v22 }
 0x201   :  { %v761_v7 = vpop.f32.mrf.mxu1 }
 0x203   :  { %v548_v3 = vpop.f32.mrf.mxu2  ;;  %v703_v4 = vpop.f32.mrf.mxu3 }
 0x204   :  { %v549_v29 = vadd.f32 %v548_v3, %v516_v53 }
 0x206   :  { %v574_v34 = vadd.f32 %v573_v61, %v549_v29 }
 0x208   :  { %v864_v10 = vpop.f32.mrf.mxu0 }
 0x209   :  { %v891_v51 = vpop.f32.mrf.mxu1 }
 0x20b   :  { %v676_v8 = vpop.f32.mrf.mxu2  ;;  %v834_v9 = vpop.f32.mrf.mxu3 }
 0x20c   :  { %v677_v21 = vadd.f32 %v676_v8, %v647_v17 }
 0x20e   :  { %v704_v63 = vadd.f32 %v703_v4, %v677_v21 }
 0x210   :  { %v981_v45 = vpop.f32.mrf.mxu0  ;;  %v737_v30 = vadd.f32 %v736_v6, %v704_v63 }
 0x211   :  { %v1022_v57 = vpop.f32.mrf.mxu1 }
 0x212   :  { %v1023_v23 = vadd.f32 %v1022_v57, %v981_v45  ;;  %v762_v36 = vadd.f32 %v761_v7, %v737_v30 }
 0x213   :  { %v793_v11 = vpop.f32.mrf.mxu2  ;;  %v949_v14 = vpop.f32.mrf.mxu3 }
 0x214   :  { %v835_v13 = vadd.f32 %v834_v9, %v793_v11 }
 0x216   :  { %v865_v16 = vadd.f32 %v864_v10, %v835_v13 }
 0x218   :  { %v892_v49 = vadd.f32 %v891_v51, %v865_v16 }
 0x219   :  { %v1112_v28 = vpop.f32.mrf.mxu0 }
 0x21a   :  { %v1137_v58 = vpop.f32.mrf.mxu1 }
 0x21b   :  { %v924_v15 = vpop.f32.mrf.mxu2  ;;  %v1079_v26 = vpop.f32.mrf.mxu3 }
 0x21c   :  { %v925_v48 = vadd.f32 %v924_v15, %v892_v49 }
 0x21e   :  { %v950_v19 = vadd.f32 %v949_v14, %v925_v48 }
 0x220   :  { %v1140_v5 = vrot.slane %v950_v19, 4 }
 0x222   :  { %v1141_v37 = vsel %vm344_vm5, %v1140_v5, %v574_v34 }
 0x223   :  { %v1052_v24 = vpop.f32.mrf.mxu2  ;;  %v1145_v41 = vperm.slane %v1141_v37, %v1467_v12 }
 0x224   :  { %v1053_v25 = vadd.f32 %v1052_v24, %v1023_v23 }
 0x226   :  { %v1080_v52 = vadd.f32 %v1079_v26, %v1053_v25 }
 0x228   :  { %v1113_v59 = vadd.f32 %v1112_v28, %v1080_v52 }
 0x22a   :  { %v1138_v32 = vadd.f32 %v1137_v58, %v1113_v59 }
 0x22c   :  { %v1146_v0 = vrot.slane %v1138_v32, 4 }
 0x22e   :  { %v1147_v39 = vsel %vm344_vm5, %v1146_v0, %v762_v36 }
 0x22f   :  { %v1151_v40 = vperm.slane %v1147_v39, %v1467_v12 }
 0x231   :  { %v1152_v44 = vrot.slane %v1151_v40, 4 }
 0x233   :  { %v1153_v47 = vsel %vm344_vm5, %v1152_v44, %v1145_v41 }
 0x234   :  { %v1157_v27 = vperm.slane %v1153_v47, %v1473_v18 }
 0x236   :  { %v1161_v54 = vperm.slane %v1157_v27, %v1467_v12  ;;  %v1162_v55 = vrot.slane %v1157_v27, 4 }
 0x238   :  { %v1163_v56 = vsel %vm344_vm5, 0.0, %v1162_v55  ;;  %v1170_v33 = vrot.slane %v1161_v54, 4 }
 0x239   :  { %v1167_v60 = vperm.slane %v1163_v56, %v1467_v12 }
 0x23b   :  { %v1168_v1 = vrot.slane %v1167_v60, 4  ;;  %v1171_v38 = vsel %vm344_vm5, %v1167_v60, %v1170_v33 }
 0x23c   :  { %v1179_v43 = vperm.slane %v1171_v38, %v1473_v18 }
 0x23d   :  { %v1169_v35 = vsel %vm344_vm5, %v1168_v1, %v1161_v54 }
 0x23e   :  { %1189 = vrot.lane.b32.xlu2 %v1179_v43, %s1372_s2  ;;  %v1175_v42 = vperm.slane %v1169_v35, %v1473_v18  ;;  %v1182_v50 = vrot.slane %v1179_v43, 4 }
 0x240   :  { %v1180_v46 = vrot.slane %v1175_v42, 4  ;;  %v1183_v62 = vsel %vm344_vm5, 0.0, %v1182_v50 }
 0x242   :  { %v1181_v61 = vsel %vm344_vm5, 0.0, %v1180_v46 }
 0x243   :  { %1185 = vrot.lane.b32.xlu1 %v1181_v61, %s1373_s3 }
 0x246   :  { %1193 = vrot.lane.b32.xlu2 %v1183_v62, %s1374_s9 }
 0x298   :  { %v1190_v12 = vpop.permute.xlu2 %1189 }
 0x2a0   :  { %v1194_v18 = vpop.permute.xlu2 %1193 }
 0x2b5   :  { %v1186_v3 = vpop.permute.xlu1 %1185 }
 0x2b6   :  { %v1196_v4 = vsel %vm84_vm0, %v1175_v42, %v1186_v3 }
 0x2b7   :  { %v1198_v6 = vsel %vm1197_vm6, %v1196_v4, %v1190_v12 }
 0x2b8   :  { %v1200_v7 = vsel %vm1199_vm7, %v1198_v6, %v1194_v18 }
 0x2b9   :  { %v1202_v8 = vadd.f32 %v1201_v2, %v1200_v7 }
 0x2bb   :  { %1203 = vst [vmem:[#allocation10] sm:$0x3] %v1202_v8 }
 0x2bc   :  { %1214 = dma.vmem_to_hbm [thread:$0]  %s1210_s11, 32, %s1212_s14, [#allocation4]  }
 0x2bd   :  { %1364 = dma.done.wait [#allocation4], 32  }
 0x2be   :  { %1365 = vsyncadd [#allocation4], 4294967264 }
 0x2bf   :  { %1219 = vsyncpa [#allocation3], 1 }
 0x2c0   :  { %1220 = vsyncpa [#allocation6], 1 }
 0x2c1   :  { %1221 = vsyncpa [#allocation9], 1 }
 0x2c2   :  { %1222 = vsyncpa [#allocation4], 1 }

</bundles_post_ra>
